<compile_context>
chip_gen: v5e
topology: v5e:2x2
jax: 0.10.0
libtpu: 0.0.40
codegen_flags: <defaults>
</compile_context>

<pallas_src>
import jax
import jax.numpy as jnp
from jax.experimental import pallas as pl
from jax.experimental.pallas import tpu as pltpu

num_leituras_por_matriz = 4
num_matrizes = 5
num_saidas = 2

IN_FEATURES = num_matrizes * num_leituras_por_matriz  # 20
H1 = 64
H2 = 32


def _round_up(x, m):
    return ((x + m - 1) // m) * m


def _mlp_kernel(x_ref, w1_ref, b1_ref, w2_ref, b2_ref, w3_ref, b3_ref, o_ref):
    # x_ref: (TB, IN_FEATURES) f32. Cast to bf16 in-kernel (free under the DMA)
    # so the first two matmuls run as native bf16 MXU passes with f32 accumulation.
    x = x_ref[...].astype(jnp.bfloat16)
    w1 = w1_ref[...].astype(jnp.bfloat16)
    w2 = w2_ref[...].astype(jnp.bfloat16)

    # camada_entrada + ReLU
    h1 = jnp.dot(x, w1, preferred_element_type=jnp.float32) + b1_ref[...]
    h1 = jnp.maximum(h1, 0.0).astype(jnp.bfloat16)

    # camada_oculta + ReLU
    h2 = jnp.dot(h1, w2, preferred_element_type=jnp.float32) + b2_ref[...]
    h2 = jnp.maximum(h2, 0.0)  # keep f32 for the final layer (precision parity)

    # camada_saida (no activation) — exact (TB, num_saidas) output, f32 end to end.
    out = jnp.dot(h2, w3_ref[...], preferred_element_type=jnp.float32) + b3_ref[...]
    o_ref[...] = out.astype(o_ref.dtype)


def rede_neural_forward(x, params, tb=4096):
    """x: any shape whose trailing dims flatten to IN_FEATURES (mimics x.view(-1, F))."""
    w1, b1, w2, b2, w3, b3 = params

    x2d = x.reshape(-1, IN_FEATURES)
    B = x2d.shape[0]

    # Batch tile: multiple of 8 (sublane), capped at `tb`, and no larger than
    # ceil(B/2) so there are at least two tiles for v7x's two TensorCores
    # whenever the batch is big enough to care.
    TB = min(tb, max(8, _round_up((B + 1) // 2, 8)))
    grid = (pl.cdiv(B, TB),)  # ragged last tile handled by Pallas (no jnp.pad copy)

    cost = pl.CostEstimate(
        flops=2 * B * (IN_FEATURES * H1 + H1 * H2 + H2 * num_saidas),
        transcendentals=0,
        bytes_accessed=(
            B * IN_FEATURES * 4                    # x read (f32)
            + B * num_saidas * 4                   # out write (f32)
            + 4 * (IN_FEATURES * H1 + H1 + H1 * H2 + H2 + H2 * num_saidas + num_saidas)
        ),
    )

    out = pl.pallas_call(
        _mlp_kernel,
        out_shape=jax.ShapeDtypeStruct((B, num_saidas), jnp.float32),
        grid=grid,
        in_specs=[
            pl.BlockSpec((TB, IN_FEATURES), lambda i: (i, 0)),    # x: tiled over batch
            pl.BlockSpec((IN_FEATURES, H1), lambda i: (0, 0)),    # weights/biases: resident
            pl.BlockSpec((1, H1), lambda i: (0, 0)),
            pl.BlockSpec((H1, H2), lambda i: (0, 0)),
            pl.BlockSpec((1, H2), lambda i: (0, 0)),
            pl.BlockSpec((H2, num_saidas), lambda i: (0, 0)),
            pl.BlockSpec((1, num_saidas), lambda i: (0, 0)),
        ],
        out_specs=pl.BlockSpec((TB, num_saidas), lambda i: (i, 0)),
        compiler_params=pltpu.CompilerParams(
            dimension_semantics=("parallel",),   # shard batch tiles across TCs on v7x
            vmem_limit_bytes=32 * 1024 * 1024,   # fits all gens; above v5e's 16 MiB default
        ),
        cost_estimate=cost,
    )(x2d, w1, b1, w2, b2, w3, b3)

    return out


def init_params(key):
    """Deterministic init mimicking PyTorch nn.Linear (uniform +/- 1/sqrt(fan_in)).
    Weights stored transposed: (in_features, out_features). All f32."""
    ks = jax.random.split(key, 6)

    def linear(kw, kb, fan_in, fan_out):
        bound = 1.0 / jnp.sqrt(fan_in)
        w = jax.random.uniform(kw, (fan_in, fan_out), jnp.float32, -bound, bound)
        b = jax.random.uniform(kb, (1, fan_out), jnp.float32, -bound, bound)
        return w, b

    w1, b1 = linear(ks[0], ks[1], IN_FEATURES, H1)
    w2, b2 = linear(ks[2], ks[3], H1, H2)
    w3, b3 = linear(ks[4], ks[5], H2, num_saidas)
    return (w1, b1, w2, b2, w3, b3)


if __name__ == "__main__":
    key = jax.random.PRNGKey(0)
    pkey, xkey = jax.random.split(key)

    params = init_params(pkey)

    # Small batch: 8 samples, each with (num_matrizes, num_leituras_por_matriz)
    # readings -> flattened to 20 features inside the wrapper (like x.view(-1, 20)).
    batch = 8
    x = jax.random.normal(xkey, (batch, num_matrizes, num_leituras_por_matriz),
                          dtype=jnp.float32)

    out = jax.block_until_ready(rede_neural_forward(x, params))

    # Reference with the same precision chain as the kernel
    # (bf16 MXU + f32 accumulation for layers 1-2, full f32 for the output layer).
    w1, b1, w2, b2, w3, b3 = params
    xf = x.reshape(-1, IN_FEATURES)
    h = jnp.dot(xf.astype(jnp.bfloat16), w1.astype(jnp.bfloat16),
                preferred_element_type=jnp.float32) + b1
    h = jnp.maximum(h, 0.0).astype(jnp.bfloat16)
    h = jnp.dot(h, w2.astype(jnp.bfloat16),
                preferred_element_type=jnp.float32) + b2
    h = jnp.maximum(h, 0.0)
    ref = jnp.dot(h, w3, preferred_element_type=jnp.float32) + b3

    assert out.shape == (batch, num_saidas)
    assert jnp.allclose(out, ref, atol=1e-3, rtol=1e-3)
    # Loose sanity check against the full-f32 chain as well.
    hf = jnp.maximum(xf @ w1 + b1, 0.0)
    hf = jnp.maximum(hf @ w2 + b2, 0.0)
    ref_f32 = hf @ w3 + b3
    assert jnp.allclose(out, ref_f32, atol=5e-2, rtol=5e-2)

    print("KERNEL_OK")
</pallas_src>

<mosaic_0001>
module attributes {stable_mosaic.version = 11 : i64} {
  func.func @_mlp_kernel(%arg0: i32, %arg1: memref<8x20xf32, #tpu.memory_space<vmem>>, %arg2: memref<20x64xf32, #tpu.memory_space<vmem>>, %arg3: memref<1x64xf32, #tpu.memory_space<vmem>>, %arg4: memref<64x32xf32, #tpu.memory_space<vmem>>, %arg5: memref<1x32xf32, #tpu.memory_space<vmem>>, %arg6: memref<32x2xf32, #tpu.memory_space<vmem>>, %arg7: memref<1x2xf32, #tpu.memory_space<vmem>>, %arg8: memref<8x2xf32, #tpu.memory_space<vmem>>) attributes {dimension_semantics = [#tpu.dimension_semantics<parallel>], iteration_bounds = array<i64: 1>, scalar_prefetch = 0 : i64, scratch_operands = 0 : i64, tpu.core_type = #tpu.core_type<tc>, window_params = [{transform_indices = @transform_0, window_bounds = array<i64: 8, 20>}, {pipeline_mode = #tpu.pipeline_mode<synchronous>, transform_indices = @transform_1, window_bounds = array<i64: 20, 64>}, {pipeline_mode = #tpu.pipeline_mode<synchronous>, transform_indices = @transform_2, window_bounds = array<i64: 1, 64>}, {pipeline_mode = #tpu.pipeline_mode<synchronous>, transform_indices = @transform_3, window_bounds = array<i64: 64, 32>}, {pipeline_mode = #tpu.pipeline_mode<synchronous>, transform_indices = @transform_4, window_bounds = array<i64: 1, 32>}, {pipeline_mode = #tpu.pipeline_mode<synchronous>, transform_indices = @transform_5, window_bounds = array<i64: 32, 2>}, {pipeline_mode = #tpu.pipeline_mode<synchronous>, transform_indices = @transform_6, window_bounds = array<i64: 1, 2>}, {transform_indices = @transform_7, window_bounds = array<i64: 8, 2>}]} {
    %c0 = arith.constant 0 : index
    %c0_0 = arith.constant 0 : index
    %0 = vector.load %arg1[%c0, %c0_0] : memref<8x20xf32, #tpu.memory_space<vmem>>, vector<8x20xf32>
    %1 = arith.truncf %0 : vector<8x20xf32> to vector<8x20xbf16>
    %c0_1 = arith.constant 0 : index
    %c0_2 = arith.constant 0 : index
    %2 = vector.load %arg2[%c0_1, %c0_2] : memref<20x64xf32, #tpu.memory_space<vmem>>, vector<20x64xf32>
    %3 = arith.truncf %2 : vector<20x64xf32> to vector<20x64xbf16>
    %c0_3 = arith.constant 0 : index
    %c0_4 = arith.constant 0 : index
    %4 = vector.load %arg4[%c0_3, %c0_4] : memref<64x32xf32, #tpu.memory_space<vmem>>, vector<64x32xf32>
    %5 = arith.truncf %4 : vector<64x32xf32> to vector<64x32xbf16>
    %cst = arith.constant dense<0.000000e+00> : vector<8x64xf32>
    %6 = tpu.matmul %1, %3, %cst {dimension_numbers = #tpu.dot_dimension_numbers<[1], [0], [0], [1], [0, 0, 1, 1], [], []>} : vector<8x20xbf16>, vector<20x64xbf16>, vector<8x64xf32> -> vector<8x64xf32>
    %c0_5 = arith.constant 0 : index
    %c0_6 = arith.constant 0 : index
    %7 = vector.load %arg3[%c0_5, %c0_6] : memref<1x64xf32, #tpu.memory_space<vmem>>, vector<1x64xf32>
    %8 = vector.broadcast %7 : vector<1x64xf32> to vector<8x64xf32>
    %9 = arith.addf %6, %8 : vector<8x64xf32>
    %cst_7 = arith.constant 0.000000e+00 : f32
    %10 = vector.broadcast %cst_7 : f32 to vector<8x64xf32>
    %11 = arith.maximumf %9, %10 : vector<8x64xf32>
    %12 = arith.truncf %11 : vector<8x64xf32> to vector<8x64xbf16>
    %cst_8 = arith.constant dense<0.000000e+00> : vector<8x32xf32>
    %13 = tpu.matmul %12, %5, %cst_8 {dimension_numbers = #tpu.dot_dimension_numbers<[1], [0], [0], [1], [0, 0, 1, 1], [], []>} : vector<8x64xbf16>, vector<64x32xbf16>, vector<8x32xf32> -> vector<8x32xf32>
    %c0_9 = arith.constant 0 : index
    %c0_10 = arith.constant 0 : index
    %14 = vector.load %arg5[%c0_9, %c0_10] : memref<1x32xf32, #tpu.memory_space<vmem>>, vector<1x32xf32>
    %15 = vector.broadcast %14 : vector<1x32xf32> to vector<8x32xf32>
    %16 = arith.addf %13, %15 : vector<8x32xf32>
    %cst_11 = arith.constant 0.000000e+00 : f32
    %17 = vector.broadcast %cst_11 : f32 to vector<8x32xf32>
    %18 = arith.maximumf %16, %17 : vector<8x32xf32>
    %c0_12 = arith.constant 0 : index
    %c0_13 = arith.constant 0 : index
    %19 = vector.load %arg6[%c0_12, %c0_13] : memref<32x2xf32, #tpu.memory_space<vmem>>, vector<32x2xf32>
    %cst_14 = arith.constant dense<0.000000e+00> : vector<8x2xf32>
    %20 = tpu.matmul %18, %19, %cst_14 {dimension_numbers = #tpu.dot_dimension_numbers<[1], [0], [0], [1], [0, 0, 1, 1], [], []>} : vector<8x32xf32>, vector<32x2xf32>, vector<8x2xf32> -> vector<8x2xf32>
    %c0_15 = arith.constant 0 : index
    %c0_16 = arith.constant 0 : index
    %21 = vector.load %arg7[%c0_15, %c0_16] : memref<1x2xf32, #tpu.memory_space<vmem>>, vector<1x2xf32>
    %22 = vector.broadcast %21 : vector<1x2xf32> to vector<8x2xf32>
    %23 = arith.addf %20, %22 : vector<8x2xf32>
    %c0_17 = arith.constant 0 : index
    %c0_18 = arith.constant 0 : index
    %24 = vector.load %arg8[%c0_17, %c0_18] : memref<8x2xf32, #tpu.memory_space<vmem>>, vector<8x2xf32>
    tpu.vector_store %arg8[%c0_17, %c0_18], %23 {strides = array<i32>} : memref<8x2xf32, #tpu.memory_space<vmem>>, vector<8x2xf32>,
    return
  }
  func.func @transform_0(%arg0: i32) -> (i32, i32) {
    %c0_i32 = arith.constant 0 : i32
    %c0_i32_0 = arith.constant 0 : i32
    return %arg0, %c0_i32 : i32, i32
  }
  func.func @transform_1(%arg0: i32) -> (i32, i32) {
    %c0_i32 = arith.constant 0 : i32
    %c0_i32_0 = arith.constant 0 : i32
    %c0_i32_1 = arith.constant 0 : i32
    return %c0_i32, %c0_i32_0 : i32, i32
  }
  func.func @transform_2(%arg0: i32) -> (i32, i32) {
    %c0_i32 = arith.constant 0 : i32
    %c0_i32_0 = arith.constant 0 : i32
    %c0_i32_1 = arith.constant 0 : i32
    return %c0_i32, %c0_i32_0 : i32, i32
  }
  func.func @transform_3(%arg0: i32) -> (i32, i32) {
    %c0_i32 = arith.constant 0 : i32
    %c0_i32_0 = arith.constant 0 : i32
    %c0_i32_1 = arith.constant 0 : i32
    return %c0_i32, %c0_i32_0 : i32, i32
  }
  func.func @transform_4(%arg0: i32) -> (i32, i32) {
    %c0_i32 = arith.constant 0 : i32
    %c0_i32_0 = arith.constant 0 : i32
    %c0_i32_1 = arith.constant 0 : i32
    return %c0_i32, %c0_i32_0 : i32, i32
  }
  func.func @transform_5(%arg0: i32) -> (i32, i32) {
    %c0_i32 = arith.constant 0 : i32
    %c0_i32_0 = arith.constant 0 : i32
    %c0_i32_1 = arith.constant 0 : i32
    return %c0_i32, %c0_i32_0 : i32, i32
  }
  func.func @transform_6(%arg0: i32) -> (i32, i32) {
    %c0_i32 = arith.constant 0 : i32
    %c0_i32_0 = arith.constant 0 : i32
    %c0_i32_1 = arith.constant 0 : i32
    return %c0_i32, %c0_i32_0 : i32, i32
  }
  func.func @transform_7(%arg0: i32) -> (i32, i32) {
    %c0_i32 = arith.constant 0 : i32
    %c0_i32_0 = arith.constant 0 : i32
    return %arg0, %c0_i32 : i32, i32
  }
}

</mosaic_0001>

<bundles_post_ra>
// kernel: tpu_custom_call.1
= control target key start
LH: loop header
LB: loop body
LE: loop exit
PB: predicated region body
PF: predicated region fallthrough
CT: control target
= control target key end

     0   :  { %vm54_vm0 = vcmask 1041408   ;;  %vm50_vm1 = vcmask 162816   ;;  %vm77_vm2 = vcmask 523264   ;;  %vm103_vm3 = vcmask 261120   ;;  %s239_s1 = inlined_call_operand.vmem [shape: f32[20,64], index: 1, kind: input, shape index: {}]   ;;  %s240_s3 = inlined_call_operand.vmem [shape: f32[64,32], index: 3, kind: input, shape index: {}]   ;;  %s241_s0 = inlined_call_operand.vmem [shape: f32[8,20], index: 0, kind: input, shape index: {}]   ;;  %s242_s2 = inlined_call_operand.vmem [shape: f32[1,64], index: 2, kind: input, shape index: {}]   ;;  %s243_s4 = inlined_call_operand.vmem [shape: f32[1,32], index: 4, kind: input, shape index: {}]   ;;  %s244_s5 = inlined_call_operand.vmem [shape: f32[32,2], index: 5, kind: input, shape index: {}]   ;;  %s245_s6 = inlined_call_operand.vmem [shape: f32[1,2], index: 6, kind: input, shape index: {}]   ;;  %s246_s7 = inlined_call_operand.vmem [shape: f32[8,2], index: 7, kind: output, shape index: {}]  }
   0x1   :  { %v31_v0 = vld [vmem:[%s239_s1 + $0x10] sm:$0xf]  ;;  %v29_v1 = vld [vmem:[%s239_s1] sm:$0xff]  ;;  %v30_v3 = vld [vmem:[%s239_s1 + $0x8] sm:$0xff]  ;;  %vm127_vm4 = vcmask 15360  }
   0x2   :  { %v33_v2 = vpack.c.bf16 %v31_v0, %v31_v0  ;;  %v40_v4 = vld [vmem:[%s240_s3 + $0x30] sm:$0xff]  ;;  %v41_v5 = vld [vmem:[%s240_s3 + $0x38] sm:$0xff]  ;;  %v38_v7 = vld [vmem:[%s240_s3 + $0x20] sm:$0xff]  ;;  %v32_v10 = vpack.c.bf16 %v30_v3, %v29_v1 }
   0x3   :  { %v45_v6 = vpack.c.bf16 %v41_v5, %v40_v4  ;;  %v39_v8 = vld [vmem:[%s240_s3 + $0x28] sm:$0xff]  ;;  %v27_v11 = vld [vmem:[%s241_s0] sm:$0xff]  ;;  %v36_v14 = vld [vmem:[%s240_s3 + $0x10] sm:$0xff] }
   0x4   :  { %v56_v9 = vsel %vm54_vm0, %v33_v2, 0  ;;  %v44_v12 = vpack.c.bf16 %v39_v8, %v38_v7  ;;  %v28_v13 = vpack.c.bf16 %v27_v11, %v27_v11  ;;  %v37_v15 = vld [vmem:[%s240_s3 + $0x18] sm:$0xff]  ;;  %v34_v17 = vld [vmem:[%s240_s3] sm:$0xff]  ;;  %v35_v18 = vld [vmem:[%s240_s3 + $0x8] sm:$0xff] }
   0x5   :  { %64 = vmatpush.bf16.msra.mxu0 %v56_v9  ;;  %85 = vmatpush.bf16.msra.mxu1 %v45_v6  ;;  %v43_v16 = vpack.c.bf16 %v37_v15, %v36_v14  ;;  %v42_v19 = vpack.c.bf16 %v35_v18, %v34_v17  ;;  %v98_v20 = vld [vmem:[%s244_s5 + $0x18] sm:$0xff]  ;;  %v136_v21 = vld [vmem:[%s242_s2] ss:$0 sm:$0xff]  ;;  %v97_v27 = vld [vmem:[%s244_s5 + $0x10] sm:$0xff] }
   0x6   :  { %119 = vmatpush.msra.mxu2 %v98_v20  ;;  %v96_v28 = vld [vmem:[%s244_s5 + $0x8] sm:$0xff]  ;;  %v95_v29 = vld [vmem:[%s244_s5] sm:$0xff] }
   0x7   :  { %v137_v30 = vld [vmem:[%s243_s4] ss:$0 sm:$0xff] }
   0x8   :  { %120 = vmatpush.msra.mxu2 %v97_v27  ;;  %v138_v35 = vld [vmem:[%s245_s6] ss:$0 sm:$0xff] }
   0x9   :  { %65 = vmatpush.bf16.msra.mxu0 %v32_v10  ;;  %86 = vmatpush.bf16.msra.mxu1 %v44_v12 }
   0xa   :  { %121 = vmatpush.msra.mxu2 %v96_v28 }
   0xc   :  { %133 = vmatmul.msk.bf16.vlgmr.msra.gmra.mxu0 %vm50_vm1, %v28_v13  ;;  %122 = vmatpush.msra.mxu2 %v95_v29 }
   0xd   :  { %87 = vmatpush.bf16.msra.mxu1 %v43_v16 }
  0x11   :  { %88 = vmatpush.bf16.msra.mxu1 %v42_v19 }
  0x89   :  { %v67_v22 = vpop.f32.mrf.mxu0 }
  0x8a   :  { %v68_v23 = vadd.f32 %v136_v21, %v67_v22 }
  0x8c   :  { %v71_v24 = vmax.f32 %v68_v23, 0.0 }
  0x8e   :  { %v72_v25 = vpack.c.bf16 %v71_v24, %v71_v24 }
  0x90   :  { %134 = vmatmul.msk.bf16.vlgmr.msra.gmra.mxu1 %vm77_vm2, %v72_v25 }
  0x91   :  { %v69_v26 = vpop.f32.mrf.mxu0 }
 0x10d   :  { %v90_v31 = vpop.f32.mrf.mxu1 }
 0x10e   :  { %v91_v32 = vadd.f32 %v137_v30, %v90_v31 }
 0x110   :  { %v94_v33 = vmax.f32 %v91_v32, 0.0 }
 0x112   :  { %135 = vmatmul.msk.f32.vlgmr.msra.gmra.mxu2 %vm103_vm3, %v94_v33 }
 0x115   :  { %v92_v34 = vpop.f32.mrf.mxu1 }
 0x195   :  { %v124_v36 = vpop.f32.mrf.mxu2 }
 0x196   :  { %v125_v37 = vadd.f32 %v138_v35, %v124_v36 }
 0x198   :  { %128 = vst.msk [vmem:[%s246_s7] sm:$0xff] %vm127_vm4, %v125_v37 }

</bundles_post_ra>
